<compile_context>
chip_gen: v7x
topology: tpu7x:2x2x1
jax: 0.10.0
libtpu: 0.0.40
codegen_flags: <defaults>
</compile_context>

<pallas_src>
import jax
import jax.numpy as jnp
from jax.experimental import pallas as pl
from jax.experimental.pallas import tpu as pltpu

LANES = 128                      # batch rows per group, mapped to the lane axis
TILE_BUDGET = 5 * 1024 * 1024    # bytes per x tile buffer (Pallas double-buffers)
ROWS_PER_BLOCK_MAX = 8           # max 128-row groups per grid block


def _wide_kernel_single(x_ref, w_ref, o_ref):
    # Whole feature dim in one block; grid is 1-D over batch-row blocks.
    # x_ref: (R, 128, D)   w_ref: (1, D) [resident]   o_ref: (R, 128) f32
    x32 = x_ref[...].astype(jnp.float32)
    w32 = w_ref[...].astype(jnp.float32)
    # VPU multiply + XLU lane reduce, streamed vreg-by-vreg by Mosaic/LLO.
    o_ref[...] = jnp.sum(x32 * w32, axis=-1)


def _wide_kernel_ktiled(x_ref, w_ref, o_ref, acc_ref):
    # Feature dim tiled along a trailing "arbitrary" reduction axis.
    # x_ref: (R, 128, TK)  w_ref: (1, TK)  o_ref/acc_ref: (R, 128) f32
    k = pl.program_id(1)

    @pl.when(k == 0)
    def _():
        acc_ref[...] = jnp.zeros_like(acc_ref)

    x32 = x_ref[...].astype(jnp.float32)
    w32 = w_ref[...].astype(jnp.float32)
    acc_ref[...] += jnp.sum(x32 * w32, axis=-1)

    @pl.when(k == pl.num_programs(1) - 1)
    def _():
        o_ref[...] = acc_ref[...]


def _choose_row_blocking(num_groups, r_cap):
    """Pick (NB, R): NB*R >= num_groups, R <= r_cap, minimal padding,
    and NB >= 2 whenever there are >= 2 groups (v7x megacore)."""
    min_blocks = 2 if num_groups >= 2 else 1
    nb = max(min_blocks, -(-num_groups // r_cap))   # ceil div
    r = -(-num_groups // nb)
    return nb, r


def wide_forward(x, weight, bias):
    """x: (B, D); weight: (1, D); bias: (1,).  Returns (B, 1) = x @ W.T + b."""
    B, D = x.shape
    assert weight.shape == (1, D)
    itemsize = jnp.dtype(x.dtype).itemsize
    out_dtype = jnp.result_type(x.dtype, weight.dtype)

    G = -(-B // LANES)                      # number of 128-row batch groups
    group_bytes = LANES * D * itemsize      # one group x all features

    if group_bytes <= TILE_BUDGET:
        # ---- single-K-block path: 1-D grid over row blocks, no D padding ----
        r_cap = min(ROWS_PER_BLOCK_MAX, max(1, TILE_BUDGET // group_bytes))
        NB, R = _choose_row_blocking(G, r_cap)
        TK, D_pad, KB = D, D, 1
    else:
        # ---- K-tiled path (very wide feature dim) ---------------------------
        NB, R = _choose_row_blocking(G, ROWS_PER_BLOCK_MAX)
        # TODO(synk): if D is not a multiple of 128 here we still jnp.pad x
        # (full HBM copy); only hit for huge ragged D (<1% extra columns).
        D_pad = -(-D // LANES) * LANES
        max_tk = max(LANES, (TILE_BUDGET // (R * LANES * itemsize)) // LANES * LANES)
        TK = LANES
        for cand in range(LANES, max_tk + 1, LANES):
            if D_pad % cand == 0:
                TK = cand                    # largest multiple of 128 dividing D_pad
        KB = D_pad // TK

    B_pad = NB * R * LANES

    # Zero padding does not change x @ W.T (no NaN risk: x itself is padded).
    x_p = x
    if (B_pad != B) or (D_pad != D):
        x_p = jnp.pad(x, ((0, B_pad - B), (0, D_pad - D)))
    w_p = weight
    if D_pad != D:
        w_p = jnp.pad(weight, ((0, 0), (0, D_pad - D)))

    # Row-major reshape: a pure view when no padding occurred.
    x4 = x_p.reshape(NB, R, LANES, D_pad)

    cost = pl.CostEstimate(
        flops=2 * B_pad * D_pad,
        transcendentals=0,
        bytes_accessed=(itemsize * B_pad * D_pad
                        + jnp.dtype(w_p.dtype).itemsize * D_pad
                        + 4 * B_pad))

    if KB == 1:
        out = pl.pallas_call(
            _wide_kernel_single,
            out_shape=jax.ShapeDtypeStruct((NB, R, LANES), jnp.float32),
            grid_spec=pltpu.PrefetchScalarGridSpec(
                num_scalar_prefetch=0,
                grid=(NB,),
                in_specs=[
                    pl.BlockSpec((None, R, LANES, D_pad), lambda nb: (nb, 0, 0, 0)),
                    pl.BlockSpec((1, D_pad), lambda nb: (0, 0)),   # weight resident
                ],
                out_specs=pl.BlockSpec((None, R, LANES), lambda nb: (nb, 0, 0)),
            ),
            compiler_params=pltpu.CompilerParams(
                dimension_semantics=("parallel",)),
            cost_estimate=cost,
        )(x4, w_p)
    else:
        out = pl.pallas_call(
            _wide_kernel_ktiled,
            out_shape=jax.ShapeDtypeStruct((NB, R, LANES), jnp.float32),
            grid_spec=pltpu.PrefetchScalarGridSpec(
                num_scalar_prefetch=0,
                grid=(NB, KB),
                in_specs=[
                    pl.BlockSpec((None, R, LANES, TK), lambda nb, k: (nb, 0, 0, k)),
                    pl.BlockSpec((1, TK), lambda nb, k: (0, k)),
                ],
                out_specs=pl.BlockSpec((None, R, LANES), lambda nb, k: (nb, 0, 0)),
                scratch_shapes=[pltpu.VMEM((R, LANES), jnp.float32)],
            ),
            compiler_params=pltpu.CompilerParams(
                dimension_semantics=("parallel", "arbitrary")),
            cost_estimate=cost,
        )(x4, w_p)

    # f32 epilogue: add bias before the final cast (bf16-safe), undo layout.
    y32 = out.reshape(B_pad)[:B] + bias.astype(jnp.float32)[0]
    return y32.reshape(B, 1).astype(out_dtype)


if __name__ == "__main__":
    key = jax.random.PRNGKey(0)
    k_x, k_w, k_b = jax.random.split(key, 3)

    # ---- small shape consistent with the module ------------------------------
    batch, input_dim = 8, 32
    bound = 1.0 / jnp.sqrt(jnp.float32(input_dim))     # nn.Linear default init
    weight = jax.random.uniform(k_w, (1, input_dim), jnp.float32, -bound, bound)
    bias = jax.random.uniform(k_b, (1,), jnp.float32, -bound, bound)
    x = jax.random.normal(k_x, (batch, input_dim), jnp.float32)

    out = jax.block_until_ready(wide_forward(x, weight, bias))
    ref = jnp.dot(x, weight.T, precision=jax.lax.Precision.HIGHEST) + bias
    assert out.shape == (batch, 1)
    assert jnp.allclose(out, ref, atol=1e-5, rtol=1e-5)

    # ---- multi-row-block, single-K-block path (D=1280 fits one block) --------
    B2, D2 = 4096, 1280
    x2 = jax.random.normal(k_x, (B2, D2), jnp.float32)
    w2 = jax.random.uniform(k_w, (1, D2), jnp.float32, -0.05, 0.05)
    out2 = jax.block_until_ready(wide_forward(x2, w2, bias))
    ref2 = jnp.dot(x2, w2.T, precision=jax.lax.Precision.HIGHEST) + bias
    assert out2.shape == (B2, 1)
    assert jnp.allclose(out2, ref2, atol=1e-3, rtol=1e-4)

    # ---- K-tiled path (feature dim too wide for a single block) --------------
    B3, D3 = 512, 12800
    x3 = jax.random.normal(k_x, (B3, D3), jnp.float32)
    w3 = jax.random.uniform(k_w, (1, D3), jnp.float32, -0.02, 0.02)
    out3 = jax.block_until_ready(wide_forward(x3, w3, bias))
    ref3 = jnp.dot(x3, w3.T, precision=jax.lax.Precision.HIGHEST) + bias
    assert out3.shape == (B3, 1)
    assert jnp.allclose(out3, ref3, atol=3e-3, rtol=1e-3)

    print("KERNEL_OK")
</pallas_src>

<mosaic_0001>
module attributes {stable_mosaic.version = 11 : i64} {
  func.func @_wide_kernel_single(%arg0: i32, %arg1: memref<1x1x128x32xf32, #tpu.memory_space<vmem>>, %arg2: memref<1x32xf32, #tpu.memory_space<vmem>>, %arg3: memref<1x1x128xf32, #tpu.memory_space<vmem>>) attributes {dimension_semantics = [#tpu.dimension_semantics<parallel>], iteration_bounds = array<i64: 1>, scalar_prefetch = 0 : i64, scratch_operands = 0 : i64, tpu.core_type = #tpu.core_type<tc>, window_params = [{transform_indices = @transform_0, window_bounds = array<i64: 1, 1, 128, 32>}, {pipeline_mode = #tpu.pipeline_mode<synchronous>, transform_indices = @transform_1, window_bounds = array<i64: 1, 32>}, {transform_indices = @transform_2, window_bounds = array<i64: 1, 1, 128>}]} {
    %c0 = arith.constant 0 : index
    %c0_0 = arith.constant 0 : index
    %c0_1 = arith.constant 0 : index
    %c0_2 = arith.constant 0 : index
    %0 = vector.load %arg1[%c0, %c0_0, %c0_1, %c0_2] : memref<1x1x128x32xf32, #tpu.memory_space<vmem>>, vector<1x1x128x32xf32>
    %1 = vector.shape_cast %0 : vector<1x1x128x32xf32> to vector<1x128x32xf32>
    %c0_3 = arith.constant 0 : index
    %c0_4 = arith.constant 0 : index
    %2 = vector.load %arg2[%c0_3, %c0_4] : memref<1x32xf32, #tpu.memory_space<vmem>>, vector<1x32xf32>
    %3 = vector.shape_cast %2 : vector<1x32xf32> to vector<1x1x32xf32>
    %4 = vector.broadcast %3 : vector<1x1x32xf32> to vector<1x128x32xf32>
    %5 = arith.mulf %1, %4 : vector<1x128x32xf32>
    %cst = arith.constant dense<0.000000e+00> : vector<1x128xf32>
    %6 = vector.multi_reduction <add>, %5, %cst [2] : vector<1x128x32xf32> to vector<1x128xf32>
    %c0_5 = arith.constant 0 : index
    %c0_6 = arith.constant 0 : index
    %c0_7 = arith.constant 0 : index
    %7 = vector.load %arg3[%c0_5, %c0_6, %c0_7] : memref<1x1x128xf32, #tpu.memory_space<vmem>>, vector<1x1x128xf32>
    %8 = vector.shape_cast %7 : vector<1x1x128xf32> to vector<1x128xf32>
    %9 = vector.shape_cast %6 : vector<1x128xf32> to vector<1x1x128xf32>
    tpu.vector_store %arg3[%c0_5, %c0_6, %c0_7], %9 {strides = array<i32>} : memref<1x1x128xf32, #tpu.memory_space<vmem>>, vector<1x1x128xf32>,
    return
  }
  func.func @transform_0(%arg0: i32) -> (i32, i32, i32, i32) {
    %c0_i32 = arith.constant 0 : i32
    %c0_i32_0 = arith.constant 0 : i32
    %c0_i32_1 = arith.constant 0 : i32
    %c0_i32_2 = arith.constant 0 : i32
    return %arg0, %c0_i32, %c0_i32_0, %c0_i32_1 : i32, i32, i32, i32
  }
  func.func @transform_1(%arg0: i32) -> (i32, i32) {
    %c0_i32 = arith.constant 0 : i32
    %c0_i32_0 = arith.constant 0 : i32
    %c0_i32_1 = arith.constant 0 : i32
    return %c0_i32, %c0_i32_0 : i32, i32
  }
  func.func @transform_2(%arg0: i32) -> (i32, i32, i32) {
    %c0_i32 = arith.constant 0 : i32
    %c0_i32_0 = arith.constant 0 : i32
    %c0_i32_1 = arith.constant 0 : i32
    return %arg0, %c0_i32, %c0_i32_0 : i32, i32, i32
  }
}

</mosaic_0001>

<bundles_post_ra>
// kernel: tpu_custom_call.1
= control target key start
LH: loop header
LB: loop body
LE: loop exit
PB: predicated region body
PF: predicated region fallthrough
CT: control target
= control target key end

     0   :  { %vm51_vm0 = vcmask 261120   ;;  %s400_s0 = inlined_call_operand.vmem [shape: f32[1,1,128,32], index: 0, kind: input, shape index: {}]   ;;  %s401_s1 = inlined_call_operand.vmem [shape: f32[1,32], index: 1, kind: input, shape index: {}]   ;;  %s402_s2 = inlined_call_operand.hbm [shape: f32[1,1,128], index: 2, kind: output, shape index: {}]  }
   0x1   :  { %v12_v0 = vld [vmem:[%s400_s0] sm:$0xff]  ;;  %v14_v2 = vld [vmem:[%s400_s0 + $0x10] sm:$0xff]  ;;  %v13_v5 = vld [vmem:[%s400_s0 + $0x8] sm:$0xff] }
   0x2   :  { %v243_v1 = vld [vmem:[%s401_s1] ss:$0 sm:$0xff]  ;;  %v15_v6 = vld [vmem:[%s400_s0 + $0x18] sm:$0xff]  ;;  %v17_v10 = vld [vmem:[%s400_s0 + $0x28] sm:$0xff] }
   0x3   :  { %v35_v3 = vmul.f32 %v243_v1, %v12_v0  ;;  %v37_v4 = vmul.f32 %v243_v1, %v14_v2  ;;  %v36_v7 = vmul.f32 %v243_v1, %v13_v5  ;;  %v38_v8 = vmul.f32 %v243_v1, %v15_v6  ;;  %v16_v9 = vld [vmem:[%s400_s0 + $0x20] sm:$0xff] }
   0x4   :  { %v39_v15 = vmul.f32 %v243_v1, %v16_v9  ;;  %v40_v16 = vmul.f32 %v243_v1, %v17_v10 }
   0x5   :  { %v52_v11 = vsel %vm51_vm0, %v35_v3, 0.0  ;;  %v58_v12 = vsel %vm51_vm0, %v37_v4, 0.0  ;;  %v55_v13 = vsel %vm51_vm0, %v36_v7, 0.0  ;;  %v61_v14 = vsel %vm51_vm0, %v38_v8, 0.0 }
   0x6   :  { %53 = vadd.xlane.f32.xlu0 %v52_v11  ;;  %59 = vadd.xlane.f32.xlu1 %v58_v12 }
   0x7   :  { %7 = vsyncpa [#allocation3], 0  ;;  %v18_v17 = vld [vmem:[%s400_s0 + $0x30] sm:$0xff]  ;;  %v19_v18 = vld [vmem:[%s400_s0 + $0x38] sm:$0xff]  ;;  %v64_v19 = vsel %vm51_vm0, %v39_v15, 0.0  ;;  %v67_v20 = vsel %vm51_vm0, %v40_v16, 0.0  ;;  %v116_v49 = vlaneseq }
   0x8   :  { %v41_v21 = vmul.f32 %v243_v1, %v18_v17  ;;  %v42_v22 = vmul.f32 %v243_v1, %v19_v18  ;;  %v20_v23 = vld [vmem:[%s400_s0 + $0x40] sm:$0xff]  ;;  %v21_v24 = vld [vmem:[%s400_s0 + $0x48] sm:$0xff]  ;;  %v22_v29 = vld [vmem:[%s400_s0 + $0x50] sm:$0xff]  ;;  %vm127_vm1 = vcmask 130112   ;;  %vm134_vm2 = vcmask 195712  }
   0x9   :  { %v43_v27 = vmul.f32 %v243_v1, %v20_v23  ;;  %v44_v28 = vmul.f32 %v243_v1, %v21_v24  ;;  %v23_v30 = vld [vmem:[%s400_s0 + $0x58] sm:$0xff]  ;;  %v45_v33 = vmul.f32 %v243_v1, %v22_v29  ;;  %v24_v35 = vld [vmem:[%s400_s0 + $0x60] sm:$0xff]  ;;  %v25_v36 = vld [vmem:[%s400_s0 + $0x68] sm:$0xff]  ;;  %v352_v50 = vand.u32 127, %v116_v49 }
   0xa   :  { %56 = vadd.xlane.f32.xlu0 %v55_v13  ;;  %62 = vadd.xlane.f32.xlu1 %v61_v14  ;;  %v70_v25 = vsel %vm51_vm0, %v41_v21, 0.0  ;;  %v73_v26 = vsel %vm51_vm0, %v42_v22, 0.0  ;;  %v46_v34 = vmul.f32 %v243_v1, %v23_v30  ;;  %v47_v39 = vmul.f32 %v243_v1, %v24_v35  ;;  %v26_v41 = vld [vmem:[%s400_s0 + $0x70] sm:$0xff]  ;;  %v27_v42 = vld [vmem:[%s400_s0 + $0x78] sm:$0xff]  ;;  %s269_s0 = smov [#allocation2]  }
   0xb   :  { %v76_v31 = vsel %vm51_vm0, %v43_v27, 0.0  ;;  %v79_v32 = vsel %vm51_vm0, %v44_v28, 0.0  ;;  %v82_v37 = vsel %vm51_vm0, %v45_v33, 0.0  ;;  %v48_v40 = vmul.f32 %v243_v1, %v25_v36  ;;  %s235_s14 = sshll.u32 %s269_s0, 4  ;;  %s236_s14 = int_to_ptr.vmem [resolvable:$true] %s235_s14 }
   0xc   :  { %v85_v38 = vsel %vm51_vm0, %v46_v34, 0.0  ;;  %v88_v43 = vsel %vm51_vm0, %v47_v39, 0.0  ;;  %v49_v45 = vmul.f32 %v243_v1, %v26_v41  ;;  %v50_v46 = vmul.f32 %v243_v1, %v27_v42  ;;  %s245_s15 = scalar_lea.vmem %s236_s14, 16  ;;  %s249_s16 = scalar_lea.vmem %s236_s14, 32 }
   0xd   :  { %v91_v44 = vsel %vm51_vm0, %v48_v40, 0.0  ;;  %v354_v51 = vshrl.u32 %v116_v49, 7  ;;  %v122_v52 = vadd.s32 4294967288, %v352_v50  ;;  %v136_v53 = vadd.s32 4294967272, %v352_v50  ;;  %p246_p0 = scmp.ne.s32.totalorder %s236_s14, %s245_s15  ;;  %p250_p1 = scmp.lt.s32.totalorder %s236_s14, %s236_s14 }
   0xe   :  { %65 = vadd.xlane.f32.xlu0 %v64_v19  ;;  %68 = vadd.xlane.f32.xlu1 %v67_v20  ;;  %v94_v47 = vsel %vm51_vm0, %v49_v45, 0.0  ;;  %v97_v48 = vsel %vm51_vm0, %v50_v46, 0.0  ;;  %v129_v54 = vadd.s32 4294967280, %v352_v50  ;;  %v143_v57 = vadd.s32 4294967264, %v352_v50  ;;  %p251_p2 = scmp.lt.s32.totalorder %s249_s16, %s245_s15 }
   0xf   :  { %v120_v58 = vsub.s32 %v352_v50, %v354_v51  ;;  %v125_v59 = vsub.s32 %v122_v52, %v354_v51  ;;  %v139_v60 = vsub.s32 %v136_v53, %v354_v51  ;;  %v150_v62 = vadd.s32 4294967256, %v352_v50 }
  0x10   :  { %v132_v61 = vsub.s32 %v129_v54, %v354_v51  ;;  %v146_v1 = vsub.s32 %v143_v57, %v354_v51  ;;  %v157_v5 = vadd.s32 4294967248, %v352_v50  ;;  %vm141_vm3 = vcmask 261312   ;;  %p252_p3 = por %p251_p2, %p250_p1 }
  0x11   :  { %v153_v7 = vsub.s32 %v150_v62, %v354_v51  ;;  %v164_v8 = vadd.s32 4294967240, %v352_v50  ;;  %vm148_vm4 = vcmask 326912   ;;  %v171_v16 = vadd.s32 4294967232, %v352_v50 }
  0x12   :  { %71 = vadd.xlane.f32.xlu0 %v70_v25  ;;  %74 = vadd.xlane.f32.xlu1 %v73_v26  ;;  %v160_v15 = vsub.s32 %v157_v5, %v354_v51  ;;  %v178_v19 = vadd.s32 4294967224, %v352_v50  ;;  %vm155_vm5 = vcmask 392512   ;;  %vm162_vm6 = vcmask 458112   ;;  %p253_p4 = pnand %p252_p3, %p246_p0 }
  0x13   :  { %v167_v18 = vsub.s32 %v164_v8, %v354_v51  ;;  %v174_v24 = vsub.s32 %v171_v16, %v354_v51  ;;  %v185_v25 = vadd.s32 4294967216, %v352_v50  ;;  %v192_v29 = vadd.s32 4294967208, %v352_v50 }
  0x14   :  { %v181_v28 = vsub.s32 %v178_v19, %v354_v51  ;;  %vm169_vm7 = vcmask 523712   ;;  %vm176_vm8 = vcmask 589312   ;;  %v199_v35 = vadd.s32 4294967200, %v352_v50 }
  0x15   :  { %v188_v34 = vsub.s32 %v185_v25, %v354_v51  ;;  %v206_v39 = vadd.s32 4294967192, %v352_v50  ;;  %vm183_vm9 = vcmask 654912   ;;  %vm190_vm10 = vcmask 720512  }
  0x16   :  { %77 = vadd.xlane.f32.xlu0 %v76_v31  ;;  %80 = vadd.xlane.f32.xlu1 %v79_v32  ;;  %v213_v45 = vadd.s32 4294967184, %v352_v50  ;;  %v220_v46 = vadd.s32 4294967176, %v352_v50  ;;  %vm197_vm11 = vcmask 786112   ;;  %vm204_vm12 = vcmask 851712  }
  0x17   :  { %v209_v49 = vsub.s32 %v206_v39, %v354_v51  ;;  %vm211_vm13 = vcmask 917312   ;;  %vm218_vm14 = vcmask 982912   ;;  %vm225_vm15 = vcmask 1048512  }
  0x18   :  { %v223_v57 = vsub.s32 %v220_v46, %v354_v51 }
  0x1a   :  { %83 = vadd.xlane.f32.xlu0 %v82_v37  ;;  %86 = vadd.xlane.f32.xlu1 %v85_v38  ;;  %v195_v38 = vsub.s32 %v192_v29, %v354_v51 }
  0x1e   :  { %89 = vadd.xlane.f32.xlu0 %v88_v43  ;;  %92 = vadd.xlane.f32.xlu1 %v91_v44  ;;  %v202_v44 = vsub.s32 %v199_v35, %v354_v51 }
  0x22   :  { %95 = vadd.xlane.f32.xlu0 %v94_v47  ;;  %98 = vadd.xlane.f32.xlu1 %v97_v48 }
  0x93   :  { %v54_v55 = vpop.xlane.xlu0 %53  ;;  %v60_v56 = vpop.xlane.xlu1 %59 }
  0x94   :  { %v121_v2 = vrot.slane %v54_v55, %v120_v58  ;;  %v133_v6 = vrot.slane %v60_v56, %v132_v61  ;;  %v216_v56 = vsub.s32 %v213_v45, %v354_v51 }
  0x97   :  { %v57_v63 = vpop.xlane.xlu0 %56  ;;  %v63_v0 = vpop.xlane.xlu1 %62 }
  0x98   :  { %v126_v3 = vrot.slane %v57_v63, %v125_v59  ;;  %v140_v4 = vrot.slane %v63_v0, %v139_v60 }
  0x9a   :  { %v128_v9 = vsel %vm127_vm1, %v126_v3, %v121_v2 }
  0x9b   :  { %v135_v10 = vsel %vm134_vm2, %v133_v6, %v128_v9  ;;  %v66_v11 = vpop.xlane.xlu0 %65  ;;  %v69_v12 = vpop.xlane.xlu1 %68 }
  0x9c   :  { %v142_v13 = vsel %vm141_vm3, %v140_v4, %v135_v10  ;;  %v147_v14 = vrot.slane %v66_v11, %v146_v1  ;;  %v154_v17 = vrot.slane %v69_v12, %v153_v7 }
  0x9e   :  { %v149_v20 = vsel %vm148_vm4, %v147_v14, %v142_v13 }
  0x9f   :  { %v72_v21 = vpop.xlane.xlu0 %71  ;;  %v75_v22 = vpop.xlane.xlu1 %74  ;;  %v156_v26 = vsel %vm155_vm5, %v154_v17, %v149_v20 }
  0xa0   :  { %v161_v23 = vrot.slane %v72_v21, %v160_v15  ;;  %v168_v27 = vrot.slane %v75_v22, %v167_v18 }
  0xa2   :  { %v163_v30 = vsel %vm162_vm6, %v161_v23, %v156_v26 }
  0xa3   :  { %v78_v31 = vpop.xlane.xlu0 %77  ;;  %v81_v32 = vpop.xlane.xlu1 %80  ;;  %v170_v36 = vsel %vm169_vm7, %v168_v27, %v163_v30 }
  0xa4   :  { %v175_v33 = vrot.slane %v78_v31, %v174_v24  ;;  %v182_v37 = vrot.slane %v81_v32, %v181_v28 }
  0xa6   :  { %v177_v40 = vsel %vm176_vm8, %v175_v33, %v170_v36 }
  0xa7   :  { %v84_v41 = vpop.xlane.xlu0 %83  ;;  %v87_v42 = vpop.xlane.xlu1 %86  ;;  %v184_v47 = vsel %vm183_vm9, %v182_v37, %v177_v40 }
  0xa8   :  { %v189_v43 = vrot.slane %v84_v41, %v188_v34  ;;  %v196_v48 = vrot.slane %v87_v42, %v195_v38 }
  0xaa   :  { %v191_v52 = vsel %vm190_vm10, %v189_v43, %v184_v47 }
  0xab   :  { %v90_v53 = vpop.xlane.xlu0 %89  ;;  %v93_v54 = vpop.xlane.xlu1 %92  ;;  %v198_v58 = vsel %vm197_vm11, %v196_v48, %v191_v52 }
  0xac   :  { %v203_v55 = vrot.slane %v90_v53, %v202_v44  ;;  %v210_v59 = vrot.slane %v93_v54, %v209_v49 }
  0xae   :  { %v205_v60 = vsel %vm204_vm12, %v203_v55, %v198_v58 }
  0xaf   :  { %v96_v61 = vpop.xlane.xlu0 %95  ;;  %v99_v50 = vpop.xlane.xlu1 %98  ;;  %v212_v0 = vsel %vm211_vm13, %v210_v59, %v205_v60 }
  0xb0   :  { %v217_v62 = vrot.slane %v96_v61, %v216_v56  ;;  %v224_v63 = vrot.slane %v99_v50, %v223_v57 }
  0xb2   :  { %v219_v1 = vsel %vm218_vm14, %v217_v62, %v212_v0 }
  0xb3   :  { %v226_v2 = vsel %vm225_vm15, %v224_v63, %v219_v1 }
  0xb4   :  { %228 = vst [vmem:[#allocation2] sm:$0x1] %v226_v2 }
  0xb5   :  { %256 = shalt.err (!%p253_p4)
}
  0xb6   :  { %s257_s19 = scalar_lea.hbm %s402_s2, 16 }
  0xb7   :  { %p258_p5 = scmp.ne.s32.totalorder %s402_s2, %s257_s19  ;;  %p261_p6 = scmp.lt.u32.totalorder %s257_s19, %s402_s2 }
  0xb9   :  { %p263_p7 = pnand %p261_p6, %p258_p5 }
  0xbb   :  { %266 = shalt.err (!%p263_p7)
}
  0xbc   :  { %238 = dma.vmem_to_hbm [thread:$0]  %s236_s14, 16, %s402_s2, [#allocation3]  }
  0xbd   :  { %267 = dma.done.wait [#allocation3], 16  }
  0xbe   :  { %268 = vsyncadd [#allocation3], 4294967280 }
  0xbf   :  { %242 = vsyncpa [#allocation3], 1 }

</bundles_post_ra>
